<compile_context>
chip_gen: v5e
topology: v5e:2x2
jax: 0.10.0
libtpu: 0.0.40
codegen_flags: <defaults>
</compile_context>

<pallas_src>
import functools
import math

import jax
import jax.numpy as jnp
from jax import lax
from jax.experimental import pallas as pl
from jax.experimental.pallas import tpu as pltpu

LANES = 128
MAX_BLOCK_ROWS_NONE = 4096     # 4096 x 128 f32 = 2 MiB per block
MAX_BLOCK_ROWS_SUM = 8192      # 8192 x 128 f32 = 4 MiB per block
VMEM_LIMIT_BYTES = 48 * 1024 * 1024
PAD_VALUE = -100.0             # logit(-100) << logit(low_left) -> zero-loss region


# ----------------------------------------------------------------------------
# Coefficient setup (same math as the PyTorch __init__, plain Python).
# ----------------------------------------------------------------------------
def _get_linear(x0, f0, df0, x1):
    a = df0
    b = f0 - a * x0
    return (a, b), a * x1 + b


def _get_quadratic(x0, f0, df0, x1, df1):
    a = 0.5 * (df1 - df0) / (x1 - x0)
    b = df0 - 2 * a * x0
    c = f0 - a * x0 ** 2 - b * x0
    return (a, b, c), a * x1 ** 2 + b * x1 + c


def make_hill_coeffs(low_left=0.1, mid_left=0.2, up_left=0.4, top=0.5,
                     up_right=0.6, mid_right=0.8, low_right=0.9):
    assert 0.0 < low_left < mid_left < up_left < top < up_right < mid_right < low_right < 1.0
    coeffs = [None] * 8
    coeffs[0] = (0.0,)
    coeffs[1], f1 = _get_quadratic(low_left, 0.0, 0.0, mid_left, 1.0)
    coeffs[2], f1 = _get_linear(mid_left, f1, 1.0, up_left)
    coeffs[3], f1 = _get_quadratic(up_left, f1, 1.0, top, 0.0)
    coeffs[4], f1 = _get_quadratic(top, f1, 0.0, up_right, -1.0)
    coeffs[5], f1 = _get_linear(up_right, f1, -1.0, mid_right)
    coeffs[6], f1 = _get_quadratic(mid_right, f1, -1.0, low_right, 0.0)
    coeffs[7] = (f1,)
    thresholds = (low_left, mid_left, up_left, top, up_right, mid_right, low_right)
    return thresholds, coeffs


def _region_abc(coeffs):
    """Uniform (a, b, c) quadratic coefficients for each of the 8 regions."""
    return (
        (0.0, 0.0, float(coeffs[0][0])),                     # constant 0
        tuple(float(v) for v in coeffs[1]),                  # quadratic
        (0.0,) + tuple(float(v) for v in coeffs[2]),         # linear
        tuple(float(v) for v in coeffs[3]),                  # quadratic
        tuple(float(v) for v in coeffs[4]),                  # quadratic
        (0.0,) + tuple(float(v) for v in coeffs[5]),         # linear
        tuple(float(v) for v in coeffs[6]),                  # quadratic
        (0.0, 0.0, float(coeffs[7][0])),                     # constant f1
    )


def _logit(p):
    return math.log(p / (1.0 - p))


# ----------------------------------------------------------------------------
# In-kernel piecewise hill evaluation.
# ----------------------------------------------------------------------------
def _hill_losses(x, logit_ts, abc):
    """Piecewise-quadratic hill loss of sigmoid(x), fully vectorized."""
    xf = x.astype(jnp.float32)
    # sigmoid via tanh -> EUP slot; overlaps with the VALU compare chain below,
    # which depends only on xf (thresholds are precomputed in logit space).
    probs = 0.5 * jnp.tanh(0.5 * xf) + 0.5
    # Increasing thresholds: last satisfied (xf >= logit(t_k)) wins, which
    # reproduces the exclusive region masks of the reference forward.
    m = xf >= logit_ts[0]
    a = jnp.where(m, jnp.float32(abc[1][0]), jnp.float32(abc[0][0]))
    b = jnp.where(m, jnp.float32(abc[1][1]), jnp.float32(abc[0][1]))
    c = jnp.where(m, jnp.float32(abc[1][2]), jnp.float32(abc[0][2]))
    for k in range(1, 7):
        m = xf >= logit_ts[k]
        a = jnp.where(m, jnp.float32(abc[k + 1][0]), a)
        b = jnp.where(m, jnp.float32(abc[k + 1][1]), b)
        c = jnp.where(m, jnp.float32(abc[k + 1][2]), c)
    return (a * probs + b) * probs + c


def _hill_elementwise_kernel(x_ref, losses_ref, *, logit_ts, abc):
    losses = _hill_losses(x_ref[...], logit_ts, abc)
    if losses.dtype == losses_ref.dtype:
        losses_ref[...] = losses
    else:
        losses_ref[...] = losses.astype(losses_ref.dtype)


def _hill_partial_sum_kernel(x_ref, partial_ref, *, logit_ts, abc,
                             rows_total, block_rows):
    losses = _hill_losses(x_ref[...], logit_ts, abc)
    # Mask the ragged tail tile only when one exists (trace-time decision):
    # rows >= rows_total inside the last block hold garbage from the partial
    # block load and must not contribute to the reduction.
    if rows_total % block_rows != 0:
        i = pl.program_id(0)
        row_ids = lax.broadcasted_iota(jnp.int32, losses.shape, 0)
        valid = (i * block_rows + row_ids) < rows_total
        losses = jnp.where(valid, losses, jnp.float32(0.0))
    # Two-level reduction: (block_rows, 128) -> (8, 128) lane-dense partials.
    l3 = losses.reshape(block_rows // 8, 8, LANES)
    partial_ref[...] = jnp.sum(l3, axis=0)[None]


# ----------------------------------------------------------------------------
# Wrapper.
# ----------------------------------------------------------------------------
def _round_up(x, m):
    return ((x + m - 1) // m) * m


def sigmoid_hill_loss(logits, reduction="mean",
                      low_left=0.1, mid_left=0.2, up_left=0.4, top=0.5,
                      up_right=0.6, mid_right=0.8, low_right=0.9):
    if reduction not in ("none", "mean", "sum"):
        raise ValueError(f"Invalid reduction string '{reduction}'.")

    thresholds, coeffs = make_hill_coeffs(low_left, mid_left, up_left, top,
                                          up_right, mid_right, low_right)
    abc = _region_abc(coeffs)
    logit_ts = tuple(_logit(t) for t in thresholds)

    # Padding correctness for the reduction paths relies on these two facts.
    assert coeffs[0][0] == 0.0, "region-0 loss must be exactly zero"
    assert PAD_VALUE < logit_ts[0], "pad value must land in the zero-loss region"

    orig_shape = logits.shape
    orig_dtype = logits.dtype
    n_valid = int(logits.size)

    if n_valid == 0:
        # Match torch semantics: sum of empty = 0, mean of empty = nan.
        if reduction == "none":
            return jnp.zeros(orig_shape, orig_dtype)
        if reduction == "sum":
            return jnp.zeros((1,), orig_dtype)
        return jnp.full((1,), jnp.nan, orig_dtype)

    # --- layout: flatten to (rows_p, 128), padding only to a multiple of
    # 8 rows (sublane tile), NOT to a multiple of the block size. ---
    rows = -(-n_valid // LANES)
    rows_p = _round_up(rows, 8)
    n_total = rows_p * LANES
    n_pad = n_total - n_valid

    flat = jnp.ravel(logits)
    if n_pad:
        flat = jnp.pad(flat, (0, n_pad), constant_values=PAD_VALUE)
    x2d = flat.reshape(rows_p, LANES)

    # --- block size: big blocks to amortize per-step overhead, but at least
    # 2 tiles once the input is large enough so v7x megacore can shard them. ---
    max_block_rows = MAX_BLOCK_ROWS_NONE if reduction == "none" else MAX_BLOCK_ROWS_SUM
    target_rows = -(-rows_p // 2) if rows_p > 256 else rows_p
    block_rows = min(max_block_rows, _round_up(target_rows, 8))
    n_tiles = -(-rows_p // block_rows)

    in_bytes = n_total * x2d.dtype.itemsize
    flops_per_elem = 30  # 7 cmp + 21 sel + Horner + tanh prologue (tanh counted below)

    compiler_params = pltpu.CompilerParams(
        dimension_semantics=("parallel",),
        vmem_limit_bytes=VMEM_LIMIT_BYTES)

    if reduction == "none":
        kernel = functools.partial(_hill_elementwise_kernel,
                                   logit_ts=logit_ts, abc=abc)
        losses2d = pl.pallas_call(
            kernel,
            out_shape=jax.ShapeDtypeStruct((rows_p, LANES), orig_dtype),
            grid_spec=pltpu.PrefetchScalarGridSpec(
                num_scalar_prefetch=0,
                grid=(n_tiles,),
                in_specs=[pl.BlockSpec((block_rows, LANES), lambda i: (i, 0))],
                out_specs=pl.BlockSpec((block_rows, LANES), lambda i: (i, 0)),
            ),
            compiler_params=compiler_params,
            cost_estimate=pl.CostEstimate(
                flops=flops_per_elem * n_total,
                transcendentals=n_total,
                bytes_accessed=in_bytes + n_total * jnp.dtype(orig_dtype).itemsize),
        )(x2d)
        if n_pad == 0:
            return losses2d.reshape(orig_shape)
        return losses2d.reshape(-1)[:n_valid].reshape(orig_shape)

    # reduction in ('mean', 'sum'): no losses writeback, only lane-dense
    # (8, 128) per-tile partial sums; final reduce in the wrapper.
    kernel = functools.partial(_hill_partial_sum_kernel,
                               logit_ts=logit_ts, abc=abc,
                               rows_total=rows_p, block_rows=block_rows)
    partials = pl.pallas_call(
        kernel,
        out_shape=jax.ShapeDtypeStruct((n_tiles, 8, LANES), jnp.float32),
        grid_spec=pltpu.PrefetchScalarGridSpec(
            num_scalar_prefetch=0,
            grid=(n_tiles,),
            # NOTE(v5e): pipeline_mode=pl.Buffered(3) on this spec can further
            # hide DMA latency on memory-bound chips if needed.
            in_specs=[pl.BlockSpec((block_rows, LANES), lambda i: (i, 0))],
            out_specs=pl.BlockSpec((1, 8, LANES), lambda i: (i, 0, 0)),
        ),
        compiler_params=compiler_params,
        cost_estimate=pl.CostEstimate(
            flops=flops_per_elem * n_total,
            transcendentals=n_total,
            bytes_accessed=in_bytes + n_tiles * 8 * LANES * 4),
    )(x2d)

    loss_sum = jnp.sum(partials, dtype=jnp.float32)
    if reduction == "mean":
        return (loss_sum / jnp.float32(n_valid)).astype(orig_dtype)[None]
    return loss_sum.astype(orig_dtype)[None]


# ----------------------------------------------------------------------------
# Pure-JAX reference for a sanity check.
# ----------------------------------------------------------------------------
def _ref_sigmoid_hill_loss(logits, reduction="mean"):
    thresholds, coeffs = make_hill_coeffs()
    low_left, mid_left, up_left, top, up_right, mid_right, low_right = thresholds
    p = jax.nn.sigmoid(logits.astype(jnp.float32))

    def quad(p, c):
        return c[0] * p ** 2 + c[1] * p + c[2]

    def lin(p, c):
        return c[0] * p + c[1]

    losses = jnp.where(
        p < low_left, coeffs[0][0],
        jnp.where(p < mid_left, quad(p, coeffs[1]),
        jnp.where(p < up_left, lin(p, coeffs[2]),
        jnp.where(p < top, quad(p, coeffs[3]),
        jnp.where(p < up_right, quad(p, coeffs[4]),
        jnp.where(p < mid_right, lin(p, coeffs[5]),
        jnp.where(p < low_right, quad(p, coeffs[6]), coeffs[7][0])))))))
    if reduction == "mean":
        return jnp.mean(losses)[None]
    if reduction == "sum":
        return jnp.sum(losses)[None]
    return losses


if __name__ == "__main__":
    key = jax.random.PRNGKey(0)
    k1, k2, k3 = jax.random.split(key, 3)

    # Small NCHW-like feature map (128*8-aligned: no padding path).
    logits = jax.random.normal(k1, (2, 4, 16, 16), dtype=jnp.float32) * 3.0
    loss_mean = sigmoid_hill_loss(logits, reduction="mean")
    loss_sum = sigmoid_hill_loss(logits, reduction="sum")
    losses_none = sigmoid_hill_loss(logits, reduction="none")

    # Ragged shape to exercise the element-padding path.
    logits2 = jax.random.normal(k2, (3, 5, 37), dtype=jnp.float32) * 2.0
    loss2_mean = sigmoid_hill_loss(logits2, reduction="mean")
    loss2_none = sigmoid_hill_loss(logits2, reduction="none")

    # Larger shape to exercise multi-tile grid + masked ragged tail tile.
    logits3 = jax.random.normal(k3, (50, 20, 128), dtype=jnp.float32) * 3.0
    loss3_mean = sigmoid_hill_loss(logits3, reduction="mean")
    loss3_sum = sigmoid_hill_loss(logits3, reduction="sum")
    losses3_none = sigmoid_hill_loss(logits3, reduction="none")

    jax.block_until_ready((loss_mean, loss_sum, losses_none,
                           loss2_mean, loss2_none,
                           loss3_mean, loss3_sum, losses3_none))

    ref_mean = _ref_sigmoid_hill_loss(logits, "mean")
    ref_sum = _ref_sigmoid_hill_loss(logits, "sum")
    ref_none = _ref_sigmoid_hill_loss(logits, "none")
    ref2_mean = _ref_sigmoid_hill_loss(logits2, "mean")
    ref2_none = _ref_sigmoid_hill_loss(logits2, "none")
    ref3_mean = _ref_sigmoid_hill_loss(logits3, "mean")
    ref3_sum = _ref_sigmoid_hill_loss(logits3, "sum")
    ref3_none = _ref_sigmoid_hill_loss(logits3, "none")

    assert loss_mean.shape == (1,)
    assert loss_sum.shape == (1,)
    assert losses_none.shape == logits.shape
    assert loss2_none.shape == logits2.shape
    assert losses3_none.shape == logits3.shape
    assert jnp.allclose(loss_mean, ref_mean, atol=2e-5)
    assert jnp.allclose(loss_sum, ref_sum, atol=1e-3, rtol=1e-4)
    assert jnp.allclose(losses_none, ref_none, atol=1e-5)
    assert jnp.allclose(loss2_mean, ref2_mean, atol=2e-5)
    assert jnp.allclose(loss2_none, ref2_none, atol=1e-5)
    assert jnp.allclose(loss3_mean, ref3_mean, atol=2e-5)
    assert jnp.allclose(loss3_sum, ref3_sum, atol=1e-2, rtol=1e-4)
    assert jnp.allclose(losses3_none, ref3_none, atol=1e-5)

    print("KERNEL_OK")
</pallas_src>

<mosaic_0001>
module attributes {stable_mosaic.version = 11 : i64} {
  func.func @_hill_partial_sum_kernel(%arg0: i32, %arg1: memref<16x128xf32, #tpu.memory_space<vmem>>, %arg2: memref<1x8x128xf32, #tpu.memory_space<vmem>>) attributes {dimension_semantics = [#tpu.dimension_semantics<parallel>], iteration_bounds = array<i64: 1>, scalar_prefetch = 0 : i64, scratch_operands = 0 : i64, tpu.core_type = #tpu.core_type<tc>, window_params = [{transform_indices = @transform_0, window_bounds = array<i64: 16, 128>}, {transform_indices = @transform_1, window_bounds = array<i64: 1, 8, 128>}]} {
    %c0 = arith.constant 0 : index
    %c0_0 = arith.constant 0 : index
    %0 = vector.load %arg1[%c0, %c0_0] : memref<16x128xf32, #tpu.memory_space<vmem>>, vector<16x128xf32>
    %cst = arith.constant 5.000000e-01 : f32
    %1 = vector.broadcast %cst : f32 to vector<16x128xf32>
    %2 = arith.mulf %1, %0 : vector<16x128xf32>
    %3 = math.tanh %2 : vector<16x128xf32>
    %cst_1 = arith.constant 5.000000e-01 : f32
    %4 = vector.broadcast %cst_1 : f32 to vector<16x128xf32>
    %5 = arith.mulf %4, %3 : vector<16x128xf32>
    %cst_2 = arith.constant 5.000000e-01 : f32
    %6 = vector.broadcast %cst_2 : f32 to vector<16x128xf32>
    %7 = arith.addf %5, %6 : vector<16x128xf32>
    %cst_3 = arith.constant -2.19722462 : f32
    %8 = vector.broadcast %cst_3 : f32 to vector<16x128xf32>
    %9 = arith.cmpf oge, %0, %8 : vector<16x128xf32>
    %cst_4 = arith.constant 5.000000e+00 : f32
    %cst_5 = arith.constant 0.000000e+00 : f32
    %10 = vector.broadcast %cst_4 : f32 to vector<16x128xf32>
    %11 = vector.broadcast %cst_5 : f32 to vector<16x128xf32>
    %12 = arith.select %9, %10, %11 : vector<16x128xi1>, vector<16x128xf32>
    %cst_6 = arith.constant -1.000000e+00 : f32
    %cst_7 = arith.constant 0.000000e+00 : f32
    %13 = vector.broadcast %cst_6 : f32 to vector<16x128xf32>
    %14 = vector.broadcast %cst_7 : f32 to vector<16x128xf32>
    %15 = arith.select %9, %13, %14 : vector<16x128xi1>, vector<16x128xf32>
    %cst_8 = arith.constant 5.000000e-02 : f32
    %cst_9 = arith.constant 0.000000e+00 : f32
    %16 = vector.broadcast %cst_8 : f32 to vector<16x128xf32>
    %17 = vector.broadcast %cst_9 : f32 to vector<16x128xf32>
    %18 = arith.select %9, %16, %17 : vector<16x128xi1>, vector<16x128xf32>
    %cst_10 = arith.constant -1.38629436 : f32
    %19 = vector.broadcast %cst_10 : f32 to vector<16x128xf32>
    %20 = arith.cmpf oge, %0, %19 : vector<16x128xf32>
    %cst_11 = arith.constant 0.000000e+00 : f32
    %21 = vector.broadcast %cst_11 : f32 to vector<16x128xf32>
    %22 = arith.select %20, %21, %12 : vector<16x128xi1>, vector<16x128xf32>
    %cst_12 = arith.constant 1.000000e+00 : f32
    %23 = vector.broadcast %cst_12 : f32 to vector<16x128xf32>
    %24 = arith.select %20, %23, %15 : vector<16x128xi1>, vector<16x128xf32>
    %cst_13 = arith.constant -1.500000e-01 : f32
    %25 = vector.broadcast %cst_13 : f32 to vector<16x128xf32>
    %26 = arith.select %20, %25, %18 : vector<16x128xi1>, vector<16x128xf32>
    %cst_14 = arith.constant -0.405465096 : f32
    %27 = vector.broadcast %cst_14 : f32 to vector<16x128xf32>
    %28 = arith.cmpf oge, %0, %27 : vector<16x128xf32>
    %cst_15 = arith.constant -5.000000e+00 : f32
    %29 = vector.broadcast %cst_15 : f32 to vector<16x128xf32>
    %30 = arith.select %28, %29, %22 : vector<16x128xi1>, vector<16x128xf32>
    %cst_16 = arith.constant 5.000000e+00 : f32
    %31 = vector.broadcast %cst_16 : f32 to vector<16x128xf32>
    %32 = arith.select %28, %31, %24 : vector<16x128xi1>, vector<16x128xf32>
    %cst_17 = arith.constant -0.949999988 : f32
    %33 = vector.broadcast %cst_17 : f32 to vector<16x128xf32>
    %34 = arith.select %28, %33, %26 : vector<16x128xi1>, vector<16x128xf32>
    %cst_18 = arith.constant 0.000000e+00 : f32
    %35 = vector.broadcast %cst_18 : f32 to vector<16x128xf32>
    %36 = arith.cmpf oge, %0, %35 : vector<16x128xf32>
    %cst_19 = arith.constant -5.000000e+00 : f32
    %37 = vector.broadcast %cst_19 : f32 to vector<16x128xf32>
    %38 = arith.select %36, %37, %30 : vector<16x128xi1>, vector<16x128xf32>
    %cst_20 = arith.constant 5.000000e+00 : f32
    %39 = vector.broadcast %cst_20 : f32 to vector<16x128xf32>
    %40 = arith.select %36, %39, %32 : vector<16x128xi1>, vector<16x128xf32>
    %cst_21 = arith.constant -0.949999988 : f32
    %41 = vector.broadcast %cst_21 : f32 to vector<16x128xf32>
    %42 = arith.select %36, %41, %34 : vector<16x128xi1>, vector<16x128xf32>
    %cst_22 = arith.constant 0.405465096 : f32
    %43 = vector.broadcast %cst_22 : f32 to vector<16x128xf32>
    %44 = arith.cmpf oge, %0, %43 : vector<16x128xf32>
    %cst_23 = arith.constant 0.000000e+00 : f32
    %45 = vector.broadcast %cst_23 : f32 to vector<16x128xf32>
    %46 = arith.select %44, %45, %38 : vector<16x128xi1>, vector<16x128xf32>
    %cst_24 = arith.constant -1.000000e+00 : f32
    %47 = vector.broadcast %cst_24 : f32 to vector<16x128xf32>
    %48 = arith.select %44, %47, %40 : vector<16x128xi1>, vector<16x128xf32>
    %cst_25 = arith.constant 8.500000e-01 : f32
    %49 = vector.broadcast %cst_25 : f32 to vector<16x128xf32>
    %50 = arith.select %44, %49, %42 : vector<16x128xi1>, vector<16x128xf32>
    %cst_26 = arith.constant 1.38629436 : f32
    %51 = vector.broadcast %cst_26 : f32 to vector<16x128xf32>
    %52 = arith.cmpf oge, %0, %51 : vector<16x128xf32>
    %cst_27 = arith.constant 5.000000e+00 : f32
    %53 = vector.broadcast %cst_27 : f32 to vector<16x128xf32>
    %54 = arith.select %52, %53, %46 : vector<16x128xi1>, vector<16x128xf32>
    %cst_28 = arith.constant -9.000000e+00 : f32
    %55 = vector.broadcast %cst_28 : f32 to vector<16x128xf32>
    %56 = arith.select %52, %55, %48 : vector<16x128xi1>, vector<16x128xf32>
    %cst_29 = arith.constant 4.050000e+00 : f32
    %57 = vector.broadcast %cst_29 : f32 to vector<16x128xf32>
    %58 = arith.select %52, %57, %50 : vector<16x128xi1>, vector<16x128xf32>
    %cst_30 = arith.constant 2.19722462 : f32
    %59 = vector.broadcast %cst_30 : f32 to vector<16x128xf32>
    %60 = arith.cmpf oge, %0, %59 : vector<16x128xf32>
    %cst_31 = arith.constant 0.000000e+00 : f32
    %61 = vector.broadcast %cst_31 : f32 to vector<16x128xf32>
    %62 = arith.select %60, %61, %54 : vector<16x128xi1>, vector<16x128xf32>
    %cst_32 = arith.constant 0.000000e+00 : f32
    %63 = vector.broadcast %cst_32 : f32 to vector<16x128xf32>
    %64 = arith.select %60, %63, %56 : vector<16x128xi1>, vector<16x128xf32>
    %cst_33 = arith.constant 0.000000e+00 : f32
    %65 = vector.broadcast %cst_33 : f32 to vector<16x128xf32>
    %66 = arith.select %60, %65, %58 : vector<16x128xi1>, vector<16x128xf32>
    %67 = arith.mulf %62, %7 : vector<16x128xf32>
    %68 = arith.addf %67, %64 : vector<16x128xf32>
    %69 = arith.mulf %68, %7 : vector<16x128xf32>
    %70 = arith.addf %69, %66 : vector<16x128xf32>
    %71 = vector.shape_cast %70 : vector<16x128xf32> to vector<2x8x128xf32>
    %cst_34 = arith.constant dense<0.000000e+00> : vector<8x128xf32>
    %72 = vector.multi_reduction <add>, %71, %cst_34 [0] : vector<2x8x128xf32> to vector<8x128xf32>
    %73 = vector.shape_cast %72 : vector<8x128xf32> to vector<1x8x128xf32>
    %c0_35 = arith.constant 0 : index
    %c0_36 = arith.constant 0 : index
    %c0_37 = arith.constant 0 : index
    %74 = vector.load %arg2[%c0_35, %c0_36, %c0_37] : memref<1x8x128xf32, #tpu.memory_space<vmem>>, vector<1x8x128xf32>
    tpu.vector_store %arg2[%c0_35, %c0_36, %c0_37], %73 {strides = array<i32>} : memref<1x8x128xf32, #tpu.memory_space<vmem>>, vector<1x8x128xf32>,
    return
  }
  func.func @transform_0(%arg0: i32) -> (i32, i32) {
    %c0_i32 = arith.constant 0 : i32
    %c0_i32_0 = arith.constant 0 : i32
    return %arg0, %c0_i32 : i32, i32
  }
  func.func @transform_1(%arg0: i32) -> (i32, i32, i32) {
    %c0_i32 = arith.constant 0 : i32
    %c0_i32_0 = arith.constant 0 : i32
    %c0_i32_1 = arith.constant 0 : i32
    return %arg0, %c0_i32, %c0_i32_0 : i32, i32, i32
  }
}

</mosaic_0001>

<bundles_post_ra>
// kernel: tpu_custom_call.1
= control target key start
LH: loop header
LB: loop body
LE: loop exit
PB: predicated region body
PF: predicated region fallthrough
CT: control target
= control target key end

     0   :  { %6 = vsyncpa [#allocation3], 0  ;;  %s232_s0 = inlined_call_operand.hbm [shape: f32[16,128], index: 0, kind: input, shape index: {}]   ;;  %s233_s1 = inlined_call_operand.hbm [shape: f32[1,8,128], index: 1, kind: output, shape index: {}]  }
   0x1   :  { %7 = vsyncpa [#allocation4], 0  ;;  %s12_s8 = sshll.u32 %s232_s0, 4  ;;  %s179_s9 = smov [#allocation2]   ;;  %s13_s8 = int_to_ptr.hbm [resolvable:$true] %s12_s8 }
   0x2   :  { %s14_s10 = sshll.u32 %s179_s9, 4  ;;  %s180_s11 = smov 128   ;;  %s15_s10 = int_to_ptr.vmem [resolvable:$true] %s14_s10 }
   0x3   :  { %s181_s12 = smov 8  }
   0x4   :  { %20 = dma.hbm_to_vmem [thread:$0]  %s13_s8, 256, %s15_s10, [#allocation3], %s180_s11, %s180_s11, %s181_s12  }
   0x5   :  { %175 = dma.done.wait [#allocation3], 256  }
   0x6   :  { %176 = vsyncadd [#allocation3], 4294967040  ;;  %v197_v0 = vld [vmem:[#allocation2] sm:$0xff]  ;;  %v199_v1 = vld [vmem:[#allocation2 + $0x8] sm:$0xff]  ;;  %v182_v4 = vmov 0.0   ;;  %s183_s0 = smov [#allocation5]  }
   0x7   :  { %v27_v2 = vmul.f32 0.5, %v197_v0  ;;  %v28_v3 = vmul.f32 0.5, %v199_v1  ;;  %vm35_vm0 = vcmp.ge.f32.partialorder %v197_v0, -2.1972246  ;;  %vm36_vm1 = vcmp.ge.f32.partialorder %v199_v1, -2.1972246 }
   0x8   :  { %v37_v5 = vsel %vm35_vm0, 5.0, %v182_v4  ;;  %v38_v6 = vsel %vm36_vm1, 5.0, %v182_v4  ;;  %v39_v7 = vsel %vm35_vm0, -1.0, %v182_v4  ;;  %v40_v8 = vsel %vm36_vm1, -1.0, %v182_v4  ;;  %s106_s13 = sshll.u32 %s183_s0, 4  ;;  %s108_s16 = sshll.u32 %s233_s1, 4  ;;  %s107_s13 = int_to_ptr.vmem [resolvable:$true] %s106_s13  ;;  %s109_s16 = int_to_ptr.hbm [resolvable:$true] %s108_s16 }
   0x9   :  { %123 = vtanh.f32 %v27_v2  ;;  %v41_v9 = vsel %vm35_vm0, 0.05, %v182_v4  ;;  %v42_v10 = vsel %vm36_vm1, 0.05, %v182_v4  ;;  %vm43_vm2 = vcmp.ge.f32.partialorder %v197_v0, -1.3862944 }
   0xa   :  { %125 = vtanh.f32 %v28_v3  ;;  %vm44_vm3 = vcmp.ge.f32.partialorder %v199_v1, -1.3862944  ;;  %v45_v11 = vsel %vm43_vm2, 0.0, %v37_v5  ;;  %v47_v12 = vsel %vm43_vm2, 1.0, %v39_v7 }
   0xb   :  { %v46_v13 = vsel %vm44_vm3, 0.0, %v38_v6  ;;  %v48_v14 = vsel %vm44_vm3, 1.0, %v40_v8  ;;  %v49_v15 = vsel %vm43_vm2, -0.15, %v41_v9  ;;  %v50_v16 = vsel %vm44_vm3, -0.15, %v42_v10 }
   0xc   :  { %vm51_vm4 = vcmp.ge.f32.partialorder %v197_v0, -0.4054651  ;;  %vm52_vm5 = vcmp.ge.f32.partialorder %v199_v1, -0.4054651  ;;  %vm59_vm6 = vcmp.ge.f32.partialorder %v197_v0, 0.0  ;;  %vm60_vm7 = vcmp.ge.f32.partialorder %v199_v1, 0.0 }
   0xd   :  { %v53_v17 = vsel %vm51_vm4, -5.0, %v45_v11  ;;  %v54_v18 = vsel %vm52_vm5, -5.0, %v46_v13  ;;  %v55_v19 = vsel %vm51_vm4, 5.0, %v47_v12  ;;  %v56_v20 = vsel %vm52_vm5, 5.0, %v48_v14 }
   0xe   :  { %v57_v21 = vsel %vm51_vm4, -0.95, %v49_v15  ;;  %v61_v22 = vsel %vm59_vm6, -5.0, %v53_v17  ;;  %v62_v23 = vsel %vm60_vm7, -5.0, %v54_v18  ;;  %v58_v25 = vsel %vm52_vm5, -0.95, %v50_v16 }
   0xf   :  { %v124_v24 = vpop.eup %123  ;;  %v63_v26 = vsel %vm59_vm6, 5.0, %v55_v19  ;;  %v64_v27 = vsel %vm60_vm7, 5.0, %v56_v20  ;;  %v65_v28 = vsel %vm59_vm6, -0.95, %v57_v21  ;;  %vm67_vm8 = vcmp.ge.f32.partialorder %v197_v0, 0.4054651 }
  0x10   :  { %v126_v29 = vpop.eup %125  ;;  %v31_v30 = vmul.f32 0.5, %v124_v24  ;;  %vm68_vm9 = vcmp.ge.f32.partialorder %v199_v1, 0.4054651  ;;  %v69_v32 = vsel %vm67_vm8, 0.0, %v61_v22  ;;  %v71_v34 = vsel %vm67_vm8, -1.0, %v63_v26 }
  0x11   :  { %v32_v31 = vmul.f32 0.5, %v126_v29  ;;  %v70_v33 = vsel %vm68_vm9, 0.0, %v62_v23  ;;  %v66_v35 = vsel %vm60_vm7, -0.95, %v58_v25  ;;  %v72_v36 = vsel %vm68_vm9, -1.0, %v64_v27 }
  0x12   :  { %v73_v37 = vsel %vm67_vm8, 0.85, %v65_v28  ;;  %v33_v38 = vadd.f32 0.5, %v31_v30  ;;  %vm75_vm10 = vcmp.ge.f32.partialorder %v197_v0, 1.3862944 }
  0x13   :  { %v34_v39 = vadd.f32 0.5, %v32_v31  ;;  %vm76_vm11 = vcmp.ge.f32.partialorder %v199_v1, 1.3862944  ;;  %v77_v40 = vsel %vm75_vm10, 5.0, %v69_v32  ;;  %v79_v42 = vsel %vm75_vm10, -9.0, %v71_v34 }
  0x14   :  { %v78_v41 = vsel %vm76_vm11, 5.0, %v70_v33  ;;  %v80_v43 = vsel %vm76_vm11, -9.0, %v72_v36  ;;  %v74_v44 = vsel %vm68_vm9, 0.85, %v66_v35  ;;  %vm83_vm12 = vcmp.ge.f32.partialorder %v197_v0, 2.1972246 }
  0x15   :  { %vm84_vm13 = vcmp.ge.f32.partialorder %v199_v1, 2.1972246  ;;  %v85_v45 = vsel %vm83_vm12, 0.0, %v77_v40  ;;  %v87_v46 = vsel %vm83_vm12, 0.0, %v79_v42  ;;  %v81_v47 = vsel %vm75_vm10, 4.05, %v73_v37 }
  0x16   :  { %v86_v48 = vsel %vm84_vm13, 0.0, %v78_v41  ;;  %v88_v49 = vsel %vm84_vm13, 0.0, %v80_v43  ;;  %v91_v50 = vmul.f32 %v85_v45, %v33_v38  ;;  %v82_v51 = vsel %vm76_vm11, 4.05, %v74_v44 }
  0x17   :  { %v92_v52 = vmul.f32 %v86_v48, %v34_v39  ;;  %v89_v54 = vsel %vm83_vm12, 0.0, %v81_v47  ;;  %v90_v56 = vsel %vm84_vm13, 0.0, %v82_v51 }
  0x18   :  { %v93_v53 = vadd.f32 %v91_v50, %v87_v46 }
  0x19   :  { %v94_v55 = vadd.f32 %v92_v52, %v88_v49 }
  0x1a   :  { %v95_v57 = vmul.f32 %v93_v53, %v33_v38 }
  0x1b   :  { %v96_v58 = vmul.f32 %v94_v55, %v34_v39 }
  0x1c   :  { %v97_v59 = vadd.f32 %v95_v57, %v89_v54 }
  0x1d   :  { %v98_v60 = vadd.f32 %v96_v58, %v90_v56 }
  0x1f   :  { %v99_v61 = vadd.f32 %v98_v60, %v97_v59 }
  0x21   :  { %100 = vst [vmem:[#allocation5] sm:$0xff] %v99_v61 }
  0x22   :  { %111 = dma.vmem_to_hbm [thread:$0]  %s107_s13, 128, %s109_s16, [#allocation4]  }
  0x23   :  { %177 = dma.done.wait [#allocation4], 128  }
  0x24   :  { %178 = vsyncadd [#allocation4], 4294967168 }
  0x25   :  { %116 = vsyncpa [#allocation3], 1 }
  0x26   :  { %117 = vsyncpa [#allocation4], 1 }

</bundles_post_ra>
